<compile_context>
chip_gen: v5e
topology: v5e:2x2
jax: 0.10.0
libtpu: 0.0.40
codegen_flags: <defaults>
</compile_context>

<pallas_src>
import functools

import jax
import jax.numpy as jnp
from jax.experimental import pallas as pl
from jax.experimental.pallas import tpu as pltpu

_IN, _HID, _OUT = 10, 20, 2
_LANE = 128              # lane-dense padded hidden width for the MXU
_SINGLE_TILE_MAX = 512   # above this, take the tiled (grid) path


def _mlp_kernel(x_ref, w1_ref, b1_ref, w2_ref, b2_ref, o_ref):
    """x_ref: (TB, 10); w1_ref: (10, 128); w2_ref: (128, 128); biases (1, 128).

    o_ref is the narrow (TB, 2) output block; compute stays 128-lane wide
    (MXU-friendly) and only the 2 real output lanes are stored.
    """
    x = x_ref[...]                                            # (TB, 10)
    h = jnp.dot(x, w1_ref[...],
                preferred_element_type=jnp.float32)           # (TB, 128) on MXU
    h = jnp.maximum(h + b1_ref[...], 0.0)                     # bias + ReLU on VPU
    o = jnp.dot(h, w2_ref[...],
                preferred_element_type=jnp.float32)           # (TB, 128) on MXU
    o_ref[...] = (o + b2_ref[...])[:, :_OUT].astype(o_ref.dtype)  # (TB, 2) store


def pad_params(w1, b1, w2, b2):
    """One-time host-side padding to lane-dense, MXU-friendly shapes.

    w1: (10, 20) -> (10, 128); b1: (20,) -> (1, 128)
    w2: (20, 2)  -> (128, 128); b2: (2,)  -> (1, 128)
    Zero padding is inert: padded hidden lanes are relu(0 + 0) = 0 and padded
    output lanes are 0 + 0 = 0; the kernel only stores the first 2 lanes.
    NOTE: re-run pad_params whenever the underlying weights change.
    """
    w1_pad = jnp.zeros((_IN, _LANE), jnp.float32).at[:, :_HID].set(w1)
    b1_pad = jnp.zeros((1, _LANE), jnp.float32).at[:, :_HID].set(b1)
    w2_pad = jnp.zeros((_LANE, _LANE), jnp.float32).at[:_HID, :_OUT].set(w2)
    b2_pad = jnp.zeros((1, _LANE), jnp.float32).at[:, :_OUT].set(b2)
    return w1_pad, b1_pad, w2_pad, b2_pad


@functools.partial(jax.jit, static_argnames=("block_b",))
def simple_model_forward(x, w1_pad, b1_pad, w2_pad, b2_pad, *, block_b=4096):
    """x: (B, 10) f32, padded params from pad_params().  Returns (B, 2) f32."""
    B = x.shape[0]
    params = (w1_pad, b1_pad, w2_pad, b2_pad)

    if B <= min(block_b, _SINGLE_TILE_MAX):
        # Single tile: no grid, whole arrays mapped straight into VMEM; no
        # per-step pipeline prologue/epilogue overhead for tiny batches.
        return pl.pallas_call(
            _mlp_kernel,
            out_shape=jax.ShapeDtypeStruct((B, _OUT), jnp.float32),
            in_specs=[pl.BlockSpec(memory_space=pltpu.MemorySpace.VMEM)] * 5,
            out_specs=pl.BlockSpec(memory_space=pltpu.MemorySpace.VMEM),
        )(x, *params)

    # Tiled batch path.  No explicit padding of the ragged last tile: Pallas
    # clips the edge block (rows are independent; out-of-range output rows are
    # never written).  VMEM per step (double-buffered, lane-padded footprints):
    # x ~2*TB*128*4, out ~2*TB*128*4, hidden ~TB*128*4, weights ~70 KiB
    # -> ~10-12 MiB at TB=4096, within the 32 MiB limit set below on all
    # generations (v5e 16 MiB default raised; v7x 64 MiB physical respected).
    num_blocks = pl.cdiv(B, block_b)
    return pl.pallas_call(
        _mlp_kernel,
        out_shape=jax.ShapeDtypeStruct((B, _OUT), jnp.float32),
        grid=(num_blocks,),
        in_specs=[
            pl.BlockSpec((block_b, _IN), lambda i: (i, 0)),     # x: batch-tiled
            pl.BlockSpec((_IN, _LANE), lambda i: (0, 0)),       # w1: replicated
            pl.BlockSpec((1, _LANE), lambda i: (0, 0)),         # b1: replicated
            pl.BlockSpec((_LANE, _LANE), lambda i: (0, 0)),     # w2: replicated
            pl.BlockSpec((1, _LANE), lambda i: (0, 0)),         # b2: replicated
        ],
        out_specs=pl.BlockSpec((block_b, _OUT), lambda i: (i, 0)),  # narrow out
        compiler_params=pltpu.CompilerParams(
            dimension_semantics=("parallel",),
            vmem_limit_bytes=32 * 1024 * 1024),
    )(x, *params)


def _init_params(key):
    """Deterministic init mimicking nn.Linear's uniform(-1/sqrt(fan_in), ...)."""
    k1, k2, k3, k4 = jax.random.split(key, 4)
    bound1 = 1.0 / (_IN ** 0.5)
    bound2 = 1.0 / (_HID ** 0.5)
    # Stored already transposed: (in_features, out_features).
    w1 = jax.random.uniform(k1, (_IN, _HID), jnp.float32, -bound1, bound1)
    b1 = jax.random.uniform(k2, (_HID,), jnp.float32, -bound1, bound1)
    w2 = jax.random.uniform(k3, (_HID, _OUT), jnp.float32, -bound2, bound2)
    b2 = jax.random.uniform(k4, (_OUT,), jnp.float32, -bound2, bound2)
    return w1, b1, w2, b2


if __name__ == "__main__":
    key = jax.random.PRNGKey(0)
    kx, kp = jax.random.split(key)

    w1, b1, w2, b2 = _init_params(kp)
    padded = pad_params(w1, b1, w2, b2)

    def ref_fwd(xx):
        return jnp.maximum(xx @ w1 + b1, 0.0) @ w2 + b2

    # Small batch: exercises the no-grid single-tile path.
    B = 8
    x = jax.random.normal(kx, (B, _IN), jnp.float32)
    out = jax.block_until_ready(simple_model_forward(x, *padded))
    assert out.shape == (B, _OUT)
    assert jnp.allclose(out, ref_fwd(x), atol=1e-5, rtol=1e-5)

    # Larger, non-divisible batch: exercises the tiled path with a ragged
    # (clipped) last block and the narrow (B, 2) output writeback.
    B2 = 300
    x2 = jax.random.normal(kx, (B2, _IN), jnp.float32)
    out2 = jax.block_until_ready(simple_model_forward(x2, *padded, block_b=128))
    assert out2.shape == (B2, _OUT)
    assert jnp.allclose(out2, ref_fwd(x2), atol=1e-4, rtol=1e-4)

    print("KERNEL_OK")
</pallas_src>

<mosaic_0001>
module attributes {stable_mosaic.version = 11 : i64} {
  func.func @_mlp_kernel(%arg0: memref<8x10xf32, #tpu.memory_space<vmem>>, %arg1: memref<10x128xf32, #tpu.memory_space<vmem>>, %arg2: memref<1x128xf32, #tpu.memory_space<vmem>>, %arg3: memref<128x128xf32, #tpu.memory_space<vmem>>, %arg4: memref<1x128xf32, #tpu.memory_space<vmem>>, %arg5: memref<8x2xf32, #tpu.memory_space<vmem>>) attributes {dimension_semantics = [], scalar_prefetch = 0 : i64, scratch_operands = 0 : i64, tpu.core_type = #tpu.core_type<tc>} {
    %c0 = arith.constant 0 : index
    %c0_0 = arith.constant 0 : index
    %0 = vector.load %arg0[%c0, %c0_0] : memref<8x10xf32, #tpu.memory_space<vmem>>, vector<8x10xf32>
    %c0_1 = arith.constant 0 : index
    %c0_2 = arith.constant 0 : index
    %1 = vector.load %arg1[%c0_1, %c0_2] : memref<10x128xf32, #tpu.memory_space<vmem>>, vector<10x128xf32>
    %cst = arith.constant dense<0.000000e+00> : vector<8x128xf32>
    %2 = tpu.matmul %0, %1, %cst {dimension_numbers = #tpu.dot_dimension_numbers<[1], [0], [0], [1], [0, 0, 1, 1], [], []>} : vector<8x10xf32>, vector<10x128xf32>, vector<8x128xf32> -> vector<8x128xf32>
    %c0_3 = arith.constant 0 : index
    %c0_4 = arith.constant 0 : index
    %3 = vector.load %arg2[%c0_3, %c0_4] : memref<1x128xf32, #tpu.memory_space<vmem>>, vector<1x128xf32>
    %4 = vector.broadcast %3 : vector<1x128xf32> to vector<8x128xf32>
    %5 = arith.addf %2, %4 : vector<8x128xf32>
    %cst_5 = arith.constant 0.000000e+00 : f32
    %6 = vector.broadcast %cst_5 : f32 to vector<8x128xf32>
    %7 = arith.maximumf %5, %6 : vector<8x128xf32>
    %c0_6 = arith.constant 0 : index
    %c0_7 = arith.constant 0 : index
    %8 = vector.load %arg3[%c0_6, %c0_7] : memref<128x128xf32, #tpu.memory_space<vmem>>, vector<128x128xf32>
    %cst_8 = arith.constant dense<0.000000e+00> : vector<8x128xf32>
    %9 = tpu.matmul %7, %8, %cst_8 {dimension_numbers = #tpu.dot_dimension_numbers<[1], [0], [0], [1], [0, 0, 1, 1], [], []>} : vector<8x128xf32>, vector<128x128xf32>, vector<8x128xf32> -> vector<8x128xf32>
    %c0_9 = arith.constant 0 : index
    %c0_10 = arith.constant 0 : index
    %10 = vector.load %arg4[%c0_9, %c0_10] : memref<1x128xf32, #tpu.memory_space<vmem>>, vector<1x128xf32>
    %11 = vector.broadcast %10 : vector<1x128xf32> to vector<8x128xf32>
    %12 = arith.addf %9, %11 : vector<8x128xf32>
    %13 = vector.extract_strided_slice %12 {offsets = [0, 0], sizes = [8, 2], strides = [1, 1]} : vector<8x128xf32> to vector<8x2xf32>
    %c0_11 = arith.constant 0 : index
    %c0_12 = arith.constant 0 : index
    %14 = vector.load %arg5[%c0_11, %c0_12] : memref<8x2xf32, #tpu.memory_space<vmem>>, vector<8x2xf32>
    tpu.vector_store %arg5[%c0_11, %c0_12], %13 {strides = array<i32>} : memref<8x2xf32, #tpu.memory_space<vmem>>, vector<8x2xf32>,
    return
  }
}

</mosaic_0001>

<bundles_post_ra>
// kernel: simple_model_forward.1
= control target key start
LH: loop header
LB: loop body
LE: loop exit
PB: predicated region body
PF: predicated region fallthrough
CT: control target
= control target key end

     0   :  { %10 = vsyncpa [#allocation3], 0  ;;  %s287_s0 = inlined_call_operand.hbm [shape: f32[8,10], index: 0, kind: input, shape index: {}]   ;;  %s288_s1 = inlined_call_operand.hbm [shape: f32[10,128], index: 1, kind: input, shape index: {}]   ;;  %s289_s2 = inlined_call_operand.vmem [shape: f32[1,128], index: 2, kind: input, shape index: {}]   ;;  %s290_s3 = inlined_call_operand.hbm [shape: f32[128,128], index: 3, kind: input, shape index: {}]   ;;  %s291_s4 = inlined_call_operand.vmem [shape: f32[1,128], index: 4, kind: input, shape index: {}]   ;;  %s292_s5 = inlined_call_operand.vmem [shape: f32[8,2], index: 5, kind: output, shape index: {}]  }
   0x1   :  { %11 = vsyncpa [#allocation5], 0  ;;  %s27_s20 = sshll.u32 %s288_s1, 4  ;;  %s234_s21 = smov [#allocation4]   ;;  %s28_s20 = int_to_ptr.hbm [resolvable:$true] %s27_s20 }
   0x2   :  { %s29_s22 = sshll.u32 %s234_s21, 4  ;;  %s17_s25 = sshll.u32 %s287_s0, 4  ;;  %s30_s22 = int_to_ptr.vmem [resolvable:$true] %s29_s22  ;;  %s18_s25 = int_to_ptr.hbm [resolvable:$true] %s17_s25 }
   0x3   :  { %s235_s26 = smov 128   ;;  %s236_s27 = smov 8  }
   0x4   :  { %35 = dma.hbm_to_vmem [thread:$0]  %s28_s20, 256, %s30_s22, [#allocation5], %s235_s26, %s235_s26, %s236_s27  }
   0x5   :  { %s237_s28 = smov [#allocation2]   ;;  %s42_s7 = sshll.u32 %s290_s3, 4  ;;  %s43_s7 = int_to_ptr.hbm [resolvable:$true] %s42_s7 }
   0x6   :  { %s19_s29 = sshll.u32 %s237_s28, 4  ;;  %s238_s1 = smov [#allocation6]   ;;  %s20_s29 = int_to_ptr.vmem [resolvable:$true] %s19_s29 }
   0x7   :  { %22 = dma.hbm_to_vmem [thread:$0]  %s18_s25, 128, %s20_s29, [#allocation3]  }
   0x8   :  { %s44_s8 = sshll.u32 %s238_s1, 4  ;;  %s45_s8 = int_to_ptr.vmem [resolvable:$true] %s44_s8 }
   0x9   :  { %50 = dma.hbm_to_vmem [thread:$0]  %s43_s7, 2048, %s45_s8, [#allocation5], %s235_s26, %s235_s26, %s236_s27  }
   0xa   :  { %230 = dma.done.wait [#allocation3], 128  }
   0xb   :  { %231 = vsyncadd [#allocation3], 4294967168 }
   0xc   :  { %232 = dma.done.wait [#allocation5], 2304  }
   0xd   :  { %233 = vsyncadd [#allocation5], 4294964992  ;;  %vm76_vm0 = vcmask 1041408   ;;  %v67_v0 = vld [vmem:[#allocation4 + $0x8] sm:$0x3]  ;;  %v66_v1 = vld [vmem:[#allocation4] sm:$0xff] }
   0xe   :  { %149 = vmatpush.msk.msra.mxu0 %vm76_vm0, %v67_v0  ;;  %v65_v2 = vld [vmem:[#allocation2] sm:$0xff]  ;;  %vm72_vm1 = vcmask 80896   ;;  %v116_v3 = vld [vmem:[#allocation6 + $0x78] sm:$0xff]  ;;  %v115_v4 = vld [vmem:[#allocation6 + $0x70] sm:$0xff]  ;;  %vm141_vm2 = vcmask 15360  }
   0xf   :  { %121 = vmatpush.msra.mxu1 %v116_v3  ;;  %v114_v5 = vld [vmem:[#allocation6 + $0x68] sm:$0xff]  ;;  %v113_v6 = vld [vmem:[#allocation6 + $0x60] sm:$0xff]  ;;  %v112_v7 = vld [vmem:[#allocation6 + $0x58] sm:$0xff] }
  0x10   :  { %95 = vmatpush.msra.mxu0 %v66_v1  ;;  %v111_v8 = vld [vmem:[#allocation6 + $0x50] sm:$0xff]  ;;  %v110_v9 = vld [vmem:[#allocation6 + $0x48] sm:$0xff]  ;;  %v109_v10 = vld [vmem:[#allocation6 + $0x40] sm:$0xff] }
  0x11   :  { %150 = vmatmul.msk.f32.vlgmr.msra.gmra.mxu0 %vm72_vm1, %v65_v2  ;;  %122 = vmatpush.msra.mxu1 %v115_v4  ;;  %v108_v11 = vld [vmem:[#allocation6 + $0x38] sm:$0xff]  ;;  %v107_v12 = vld [vmem:[#allocation6 + $0x30] sm:$0xff]  ;;  %v106_v13 = vld [vmem:[#allocation6 + $0x28] sm:$0xff] }
  0x12   :  { %v105_v14 = vld [vmem:[#allocation6 + $0x20] sm:$0xff]  ;;  %v104_v15 = vld [vmem:[#allocation6 + $0x18] sm:$0xff]  ;;  %v103_v16 = vld [vmem:[#allocation6 + $0x10] sm:$0xff] }
  0x13   :  { %123 = vmatpush.msra.mxu1 %v114_v5  ;;  %v102_v17 = vld [vmem:[#allocation6 + $0x8] sm:$0xff]  ;;  %v101_v18 = vld [vmem:[#allocation6] sm:$0xff] }
  0x14   :  { %v156_v19 = vld [vmem:[%s289_s2] ss:$0 sm:$0xff] }
  0x15   :  { %124 = vmatpush.msra.mxu1 %v113_v6  ;;  %v157_v23 = vld [vmem:[%s291_s4] ss:$0 sm:$0xff] }
  0x17   :  { %125 = vmatpush.msra.mxu1 %v112_v7 }
  0x19   :  { %126 = vmatpush.msra.mxu1 %v111_v8 }
  0x1b   :  { %127 = vmatpush.msra.mxu1 %v110_v9 }
  0x1d   :  { %128 = vmatpush.msra.mxu1 %v109_v10 }
  0x1f   :  { %129 = vmatpush.msra.mxu1 %v108_v11 }
  0x21   :  { %130 = vmatpush.msra.mxu1 %v107_v12 }
  0x23   :  { %131 = vmatpush.msra.mxu1 %v106_v13 }
  0x25   :  { %132 = vmatpush.msra.mxu1 %v105_v14 }
  0x27   :  { %133 = vmatpush.msra.mxu1 %v104_v15 }
  0x29   :  { %134 = vmatpush.msra.mxu1 %v103_v16 }
  0x2b   :  { %135 = vmatpush.msra.mxu1 %v102_v17 }
  0x2d   :  { %136 = vmatpush.msra.mxu1 %v101_v18 }
  0x8e   :  { %v97_v20 = vpop.f32.mrf.mxu0 }
  0x8f   :  { %v98_v21 = vadd.f32 %v156_v19, %v97_v20 }
  0x91   :  { %v100_v22 = vmax.f32 %v98_v21, 0.0 }
  0x93   :  { %137 = vmatmul.f32.vlgmr.msra.gmra.mxu1 %v100_v22 }
 0x110   :  { %v138_v24 = vpop.f32.mrf.mxu1 }
 0x111   :  { %v139_v25 = vadd.f32 %v157_v23, %v138_v24 }
 0x113   :  { %142 = vst.msk [vmem:[%s292_s5] sm:$0xff] %vm141_vm2, %v139_v25 }
 0x114   :  { %147 = vsyncpa [#allocation3], 1 }
 0x115   :  { %148 = vsyncpa [#allocation5], 1 }

</bundles_post_ra>
